<compile_context>
chip_gen: v6e
topology: v6e:2x2x1
jax: 0.10.0
libtpu: 0.0.40
codegen_flags: <defaults>
</compile_context>

<pallas_src>
import functools

import jax
import jax.numpy as jnp
from jax.experimental import pallas as pl
from jax.experimental.pallas import tpu as pltpu


def _round_up(x: int, m: int) -> int:
    return ((x + m - 1) // m) * m


def _embedding_gather_kernel(ids_ref, table_ref, out_ref, sem, *, nbuf: int):
    """One node-tile of the DMA row gather.

    ids_ref   : SMEM (n_pad,) int32          all node ids (scalar prefetch)
    table_ref : HBM  (num_nodes, h_dim)      full embedding table (pl.ANY)
    out_ref   : VMEM (tile_n, h_dim)         output tile for this grid step
    sem       : DMA semaphores (nbuf,)       rotating in-flight window
    """
    i = pl.program_id(0)
    tile_n = out_ref.shape[0]        # static
    base = i * tile_n                # first id index handled by this tile

    def issue(j):
        row = ids_ref[base + j]      # scalar read from SMEM -> DMA src address
        pltpu.make_async_copy(
            table_ref.at[row], out_ref.at[j], sem.at[j % nbuf]).start()

    def wait_for(j):
        # Same transfer size for every row; src row index is irrelevant for
        # the wait, only the byte count / semaphore slot matter.
        pltpu.make_async_copy(
            table_ref.at[0], out_ref.at[j], sem.at[j % nbuf]).wait()

    # Prime: fill the in-flight window (nbuf <= tile_n is guaranteed).
    @pl.loop(0, nbuf)
    def _(j):
        issue(j)

    # Steady state: retire the oldest outstanding row, reuse its slot.
    @pl.loop(nbuf, tile_n)
    def _(j):
        wait_for(j - nbuf)
        issue(j)

    # Drain the last nbuf rows before the output tile is written back.
    @pl.loop(tile_n - nbuf, tile_n)
    def _(j):
        wait_for(j)


def embedding_layer_forward(node_id, weight, *, tile_n: int = 1024,
                            n_inflight: int = 16):
    """node_id: (N,) or (N, 1) int; weight: (num_nodes, h_dim).

    Returns h: (N, h_dim), identical to nn.Embedding(num_nodes, h_dim)(ids).
    """
    # Robust "squeeze": reshape(-1) avoids collapsing (1, 1) -> scalar.
    node_id = jnp.asarray(node_id).reshape(-1).astype(jnp.int32)
    n = int(node_id.shape[0])
    num_nodes, h_dim = weight.shape

    # Clamp untrusted ids (PyTorch would raise; avoid silent OOB DMA reads).
    node_id = jnp.clip(node_id, 0, num_nodes - 1)

    # Node-axis tiling: one output VMEM tile per grid step.
    if n <= tile_n:
        tile_n_eff = _round_up(max(n, 1), 8)
    else:
        tile_n_eff = tile_n
    n_pad = _round_up(n, tile_n_eff)
    num_tiles = n_pad // tile_n_eff

    # Rotating DMA window size (8-16 rows in flight is plenty).
    nbuf = max(1, min(n_inflight, tile_n_eff))

    # Padded ids fetch row 0 (valid after clamp); padded rows are sliced off.
    ids_p = jnp.pad(node_id, (0, n_pad - n))

    kernel = functools.partial(_embedding_gather_kernel, nbuf=nbuf)

    out = pl.pallas_call(
        kernel,
        out_shape=jax.ShapeDtypeStruct((n_pad, h_dim), weight.dtype),
        grid_spec=pltpu.PrefetchScalarGridSpec(
            num_scalar_prefetch=1,        # ids -> SMEM, visible to index_maps
            grid=(num_tiles,),
            in_specs=[
                # Full embedding table stays in HBM; rows DMA'd on demand.
                pl.BlockSpec(memory_space=pl.ANY),
            ],
            out_specs=pl.BlockSpec((tile_n_eff, h_dim), lambda i, ids: (i, 0)),
            scratch_shapes=[pltpu.SemaphoreType.DMA((nbuf,))],
        ),
        compiler_params=pltpu.CompilerParams(
            dimension_semantics=("parallel",)),
    )(ids_p, weight)

    return out[:n]


if __name__ == "__main__":
    key = jax.random.PRNGKey(0)
    k_w, k_id = jax.random.split(key)

    num_nodes = 64      # vocabulary size of the embedding
    h_dim = 32          # hidden dim
    n_graph_nodes = 16  # number of nodes in the graph g

    # nn.Embedding default init is N(0, 1).
    weight = jax.random.normal(k_w, (num_nodes, h_dim), dtype=jnp.float32)

    # g.ndata['id'] analogue: (N, 1) int ids, squeezed inside forward.
    node_id = jax.random.randint(
        k_id, (n_graph_nodes, 1), minval=0, maxval=num_nodes, dtype=jnp.int32)

    h = embedding_layer_forward(node_id, weight)
    h = jax.block_until_ready(h)

    # Reference check (pure JAX gather == nn.Embedding lookup).
    ref = weight[node_id.reshape(-1)]
    assert h.shape == (n_graph_nodes, h_dim)
    assert jnp.array_equal(h, ref), "mismatch vs reference embedding lookup"

    print("KERNEL_OK")
</pallas_src>

<mosaic_0001>
module attributes {stable_mosaic.version = 11 : i64} {
  func.func @_embedding_gather_kernel(%arg0: i32, %arg1: memref<16xi32, #tpu.memory_space<smem>>, %arg2: memref<64x32xf32, #tpu.memory_space<any>>, %arg3: memref<16x32xf32, #tpu.memory_space<vmem>>, %arg4: memref<16x!tpu.dma_semaphore, #tpu.memory_space<semaphore_mem>>) attributes {dimension_semantics = [#tpu.dimension_semantics<parallel>], iteration_bounds = array<i64: 1>, scalar_prefetch = 1 : i64, scratch_operands = 1 : i64, tpu.core_type = #tpu.core_type<tc>, window_params = [{}, {transform_indices = @transform_1, window_bounds = array<i64: 16, 32>}]} {
    %c16_i32 = arith.constant 16 : i32
    %0 = arith.muli %arg0, %c16_i32 : i32
    %c0_i32 = arith.constant 0 : i32
    %c16_i32_0 = arith.constant 16 : i32
    %1 = arith.addi %c0_i32, %c16_i32_0 : i32
    %c1_i32 = arith.constant 1 : i32
    scf.for %arg5 = %c0_i32 to %1 step %c1_i32  : i32 {
      %c1_i32_10 = arith.constant 1 : i32
      %4 = arith.muli %arg5, %c1_i32_10 : i32
      %c0_i32_11 = arith.constant 0 : i32
      %5 = arith.addi %c0_i32_11, %4 : i32
      %6 = arith.addi %0, %5 : i32
      %7 = arith.index_cast %6 : i32 to index
      %8 = memref.load %arg1[%7] : memref<16xi32, #tpu.memory_space<smem>>
      %c16_i32_12 = arith.constant 16 : i32
      %c0_i32_13 = arith.constant 0 : i32
      %9 = arith.cmpi eq, %c16_i32_12, %c0_i32_13 : i32
      %c1_i32_14 = arith.constant 1 : i32
      %10 = arith.select %9, %c1_i32_14, %c16_i32_12 : i32
      %11 = arith.remsi %5, %10 : i32
      %c0_i32_15 = arith.constant 0 : i32
      %12 = arith.cmpi ne, %11, %c0_i32_15 : i32
      %c0_i32_16 = arith.constant 0 : i32
      %13 = arith.cmpi slt, %11, %c0_i32_16 : i32
      %c0_i32_17 = arith.constant 0 : i32
      %14 = arith.cmpi slt, %10, %c0_i32_17 : i32
      %15 = arith.xori %13, %14 : i1
      %16 = arith.andi %15, %12 : i1
      %17 = arith.addi %11, %10 : i32
      %18 = arith.select %16, %17, %11 : i32
      %c0_i32_18 = arith.constant 0 : i32
      %19 = tpu.memref_slice %arg2[%8, %c0_i32_18] : memref<64x32xf32, #tpu.memory_space<any>> -> memref<1x32xf32, #tpu.memory_space<any>>
      %20 = tpu.memref_squeeze %19 : memref<1x32xf32, #tpu.memory_space<any>> -> memref<32xf32, #tpu.memory_space<any>>
      %c0_i32_19 = arith.constant 0 : i32
      %21 = tpu.memref_slice %arg3[%5, %c0_i32_19] : memref<16x32xf32, #tpu.memory_space<vmem>> -> memref<1x32xf32, #tpu.memory_space<vmem>>
      %22 = tpu.memref_squeeze %21 : memref<1x32xf32, #tpu.memory_space<vmem>> -> memref<32xf32, #tpu.memory_space<vmem>>
      %23 = tpu.memref_slice %arg4[%18] : memref<16x!tpu.dma_semaphore, #tpu.memory_space<semaphore_mem>> -> memref<1x!tpu.dma_semaphore, #tpu.memory_space<semaphore_mem>>
      %24 = tpu.memref_squeeze %23 : memref<1x!tpu.dma_semaphore, #tpu.memory_space<semaphore_mem>> -> memref<!tpu.dma_semaphore, #tpu.memory_space<semaphore_mem>>
      tpu.enqueue_dma source(%20 : memref<32xf32, #tpu.memory_space<any>>) target(%22 : memref<32xf32, #tpu.memory_space<vmem>>) target_semaphore(%24 : memref<!tpu.dma_semaphore, #tpu.memory_space<semaphore_mem>>)
    }
    %c16_i32_1 = arith.constant 16 : i32
    %c0_i32_2 = arith.constant 0 : i32
    %c0_i32_3 = arith.constant 0 : i32
    %2 = arith.addi %c0_i32_2, %c0_i32_3 : i32
    %c1_i32_4 = arith.constant 1 : i32
    scf.for %arg5 = %c0_i32_2 to %2 step %c1_i32_4  : i32 {
      %c1_i32_10 = arith.constant 1 : i32
      %4 = arith.muli %arg5, %c1_i32_10 : i32
      %c16_i32_11 = arith.constant 16 : i32
      %5 = arith.addi %c16_i32_11, %4 : i32
      %c16_i32_12 = arith.constant 16 : i32
      %6 = arith.subi %5, %c16_i32_12 : i32
      %c16_i32_13 = arith.constant 16 : i32
      %c0_i32_14 = arith.constant 0 : i32
      %7 = arith.cmpi eq, %c16_i32_13, %c0_i32_14 : i32
      %c1_i32_15 = arith.constant 1 : i32
      %8 = arith.select %7, %c1_i32_15, %c16_i32_13 : i32
      %9 = arith.remsi %6, %8 : i32
      %c0_i32_16 = arith.constant 0 : i32
      %10 = arith.cmpi ne, %9, %c0_i32_16 : i32
      %c0_i32_17 = arith.constant 0 : i32
      %11 = arith.cmpi slt, %9, %c0_i32_17 : i32
      %c0_i32_18 = arith.constant 0 : i32
      %12 = arith.cmpi slt, %8, %c0_i32_18 : i32
      %13 = arith.xori %11, %12 : i1
      %14 = arith.andi %13, %10 : i1
      %15 = arith.addi %9, %8 : i32
      %16 = arith.select %14, %15, %9 : i32
      %c0_i32_19 = arith.constant 0 : i32
      %c0_i32_20 = arith.constant 0 : i32
      %17 = tpu.memref_slice %arg2[%c0_i32_19, %c0_i32_20] : memref<64x32xf32, #tpu.memory_space<any>> -> memref<1x32xf32, #tpu.memory_space<any>>
      %18 = tpu.memref_squeeze %17 : memref<1x32xf32, #tpu.memory_space<any>> -> memref<32xf32, #tpu.memory_space<any>>
      %c0_i32_21 = arith.constant 0 : i32
      %19 = tpu.memref_slice %arg3[%6, %c0_i32_21] : memref<16x32xf32, #tpu.memory_space<vmem>> -> memref<1x32xf32, #tpu.memory_space<vmem>>
      %20 = tpu.memref_squeeze %19 : memref<1x32xf32, #tpu.memory_space<vmem>> -> memref<32xf32, #tpu.memory_space<vmem>>
      %21 = tpu.memref_slice %arg4[%16] : memref<16x!tpu.dma_semaphore, #tpu.memory_space<semaphore_mem>> -> memref<1x!tpu.dma_semaphore, #tpu.memory_space<semaphore_mem>>
      %22 = tpu.memref_squeeze %21 : memref<1x!tpu.dma_semaphore, #tpu.memory_space<semaphore_mem>> -> memref<!tpu.dma_semaphore, #tpu.memory_space<semaphore_mem>>
      tpu.wait_dma2 semaphore(%22 : memref<!tpu.dma_semaphore, #tpu.memory_space<semaphore_mem>>) src(%18 : memref<32xf32, #tpu.memory_space<any>>) dst(%20 : memref<32xf32, #tpu.memory_space<vmem>>)
      %23 = arith.addi %0, %5 : i32
      %24 = arith.index_cast %23 : i32 to index
      %25 = memref.load %arg1[%24] : memref<16xi32, #tpu.memory_space<smem>>
      %c16_i32_22 = arith.constant 16 : i32
      %c0_i32_23 = arith.constant 0 : i32
      %26 = arith.cmpi eq, %c16_i32_22, %c0_i32_23 : i32
      %c1_i32_24 = arith.constant 1 : i32
      %27 = arith.select %26, %c1_i32_24, %c16_i32_22 : i32
      %28 = arith.remsi %5, %27 : i32
      %c0_i32_25 = arith.constant 0 : i32
      %29 = arith.cmpi ne, %28, %c0_i32_25 : i32
      %c0_i32_26 = arith.constant 0 : i32
      %30 = arith.cmpi slt, %28, %c0_i32_26 : i32
      %c0_i32_27 = arith.constant 0 : i32
      %31 = arith.cmpi slt, %27, %c0_i32_27 : i32
      %32 = arith.xori %30, %31 : i1
      %33 = arith.andi %32, %29 : i1
      %34 = arith.addi %28, %27 : i32
      %35 = arith.select %33, %34, %28 : i32
      %c0_i32_28 = arith.constant 0 : i32
      %36 = tpu.memref_slice %arg2[%25, %c0_i32_28] : memref<64x32xf32, #tpu.memory_space<any>> -> memref<1x32xf32, #tpu.memory_space<any>>
      %37 = tpu.memref_squeeze %36 : memref<1x32xf32, #tpu.memory_space<any>> -> memref<32xf32, #tpu.memory_space<any>>
      %c0_i32_29 = arith.constant 0 : i32
      %38 = tpu.memref_slice %arg3[%5, %c0_i32_29] : memref<16x32xf32, #tpu.memory_space<vmem>> -> memref<1x32xf32, #tpu.memory_space<vmem>>
      %39 = tpu.memref_squeeze %38 : memref<1x32xf32, #tpu.memory_space<vmem>> -> memref<32xf32, #tpu.memory_space<vmem>>
      %40 = tpu.memref_slice %arg4[%35] : memref<16x!tpu.dma_semaphore, #tpu.memory_space<semaphore_mem>> -> memref<1x!tpu.dma_semaphore, #tpu.memory_space<semaphore_mem>>
      %41 = tpu.memref_squeeze %40 : memref<1x!tpu.dma_semaphore, #tpu.memory_space<semaphore_mem>> -> memref<!tpu.dma_semaphore, #tpu.memory_space<semaphore_mem>>
      tpu.enqueue_dma source(%37 : memref<32xf32, #tpu.memory_space<any>>) target(%39 : memref<32xf32, #tpu.memory_space<vmem>>) target_semaphore(%41 : memref<!tpu.dma_semaphore, #tpu.memory_space<semaphore_mem>>)
    }
    %c0_i32_5 = arith.constant 0 : i32
    %c0_i32_6 = arith.constant 0 : i32
    %c16_i32_7 = arith.constant 16 : i32
    %3 = arith.addi %c0_i32_6, %c16_i32_7 : i32
    %c1_i32_8 = arith.constant 1 : i32
    scf.for %arg5 = %c0_i32_6 to %3 step %c1_i32_8  : i32 {
      %c1_i32_10 = arith.constant 1 : i32
      %4 = arith.muli %arg5, %c1_i32_10 : i32
      %c0_i32_11 = arith.constant 0 : i32
      %5 = arith.addi %c0_i32_11, %4 : i32
      %c16_i32_12 = arith.constant 16 : i32
      %c0_i32_13 = arith.constant 0 : i32
      %6 = arith.cmpi eq, %c16_i32_12, %c0_i32_13 : i32
      %c1_i32_14 = arith.constant 1 : i32
      %7 = arith.select %6, %c1_i32_14, %c16_i32_12 : i32
      %8 = arith.remsi %5, %7 : i32
      %c0_i32_15 = arith.constant 0 : i32
      %9 = arith.cmpi ne, %8, %c0_i32_15 : i32
      %c0_i32_16 = arith.constant 0 : i32
      %10 = arith.cmpi slt, %8, %c0_i32_16 : i32
      %c0_i32_17 = arith.constant 0 : i32
      %11 = arith.cmpi slt, %7, %c0_i32_17 : i32
      %12 = arith.xori %10, %11 : i1
      %13 = arith.andi %12, %9 : i1
      %14 = arith.addi %8, %7 : i32
      %15 = arith.select %13, %14, %8 : i32
      %c0_i32_18 = arith.constant 0 : i32
      %c0_i32_19 = arith.constant 0 : i32
      %16 = tpu.memref_slice %arg2[%c0_i32_18, %c0_i32_19] : memref<64x32xf32, #tpu.memory_space<any>> -> memref<1x32xf32, #tpu.memory_space<any>>
      %17 = tpu.memref_squeeze %16 : memref<1x32xf32, #tpu.memory_space<any>> -> memref<32xf32, #tpu.memory_space<any>>
      %c0_i32_20 = arith.constant 0 : i32
      %18 = tpu.memref_slice %arg3[%5, %c0_i32_20] : memref<16x32xf32, #tpu.memory_space<vmem>> -> memref<1x32xf32, #tpu.memory_space<vmem>>
      %19 = tpu.memref_squeeze %18 : memref<1x32xf32, #tpu.memory_space<vmem>> -> memref<32xf32, #tpu.memory_space<vmem>>
      %20 = tpu.memref_slice %arg4[%15] : memref<16x!tpu.dma_semaphore, #tpu.memory_space<semaphore_mem>> -> memref<1x!tpu.dma_semaphore, #tpu.memory_space<semaphore_mem>>
      %21 = tpu.memref_squeeze %20 : memref<1x!tpu.dma_semaphore, #tpu.memory_space<semaphore_mem>> -> memref<!tpu.dma_semaphore, #tpu.memory_space<semaphore_mem>>
      tpu.wait_dma2 semaphore(%21 : memref<!tpu.dma_semaphore, #tpu.memory_space<semaphore_mem>>) src(%17 : memref<32xf32, #tpu.memory_space<any>>) dst(%19 : memref<32xf32, #tpu.memory_space<vmem>>)
    }
    %c16_i32_9 = arith.constant 16 : i32
    return
  }
  func.func @transform_1(%arg0: i32, %arg1: memref<16xi32, #tpu.memory_space<smem>>) -> (i32, i32) {
    %c0_i32 = arith.constant 0 : i32
    %c0_i32_0 = arith.constant 0 : i32
    return %arg0, %c0_i32 : i32, i32
  }
}

</mosaic_0001>

<bundles_post_ra>
// kernel: tpu_custom_call.1
= control target key start
LH: loop header
LB: loop body
LE: loop exit
PB: predicated region body
PF: predicated region fallthrough
CT: control target
= control target key end

     0   :  { %s380_s0 = inlined_call_operand.vmem [shape: s32[16], index: 0, kind: input, shape index: {}]   ;;  %s381_s1 = inlined_call_operand.vmem [shape: f32[64,32], index: 1, kind: input, shape index: {}]   ;;  %s382_s2 = inlined_call_operand.hbm [shape: f32[16,32], index: 2, kind: output, shape index: {}]  }
   0x1   :  { %s7_s11 = sshll.u32 %s380_s0, 4  ;;  %s8_s11 = int_to_ptr.vmem [resolvable:$true] %s7_s11 }
   0x2   :  { %s298_s12 = scalar_lea.vmem %s8_s11, 16  ;;  %p303_p1 = scmp.lt.s32.totalorder %s8_s11, %s8_s11 }
   0x3   :  { %p299_p0 = scmp.ne.s32.totalorder %s8_s11, %s298_s12  ;;  %p304_p2 = scmp.lt.s32.totalorder %s298_s12, %s298_s12 }
   0x5   :  { %p305_p3 = por %p304_p2, %p303_p1 }
   0x7   :  { %p306_p4 = pnand %p305_p3, %p299_p0 }
   0x9   :  { %309 = shalt.err (!%p306_p4)  }
   0xa   :  { %s352_s13 = smov [#allocation4]  }
   0xb   :  { %10 = dma.vmem_to_smem %s8_s11, 16, %s352_s13, [#allocation3] }
   0xc   :  { %338 = dma.done.wait [#allocation3], 16 }
   0xd   :  { %339 = vsyncadd [#allocation3], 4294967280 }
   0xe   :  { %12 = sfence }
   0xf   :  { %13 = vsyncpa [#allocation6], 0  ;;  %s344_s14 = smov 0  }
  0x10 LB: > { %s22_s15 = sld [smem:[#allocation4 + %s346_s14]]  ;;  %p23_p5 = scmp.lt.s32.totalorder %s346_s14, 0  ;;  %s346_s14 = sphi %s344_s14, %s20_s14  }
  0x11   : > { %s24_s0 = ssub.s32 0, %s346_s14  ;;  %s36_s23 = scalar_lea.vmem [#allocation5], %s346_s14 }
  0x12   : > { %s256_s16 = smin.u32 %s346_s14, %s24_s0 }
  0x13   : > { %s26_s17 = sand.u32 15, %s256_s16  }
  0x14   : > { %s27_s18 = ssub.s32 0, %s26_s17 }
  0x15   : > { %s384_s18 = smov (!%p23_p5, %s27_s18), %s26_s17 }
  0x16   : > { %s35_s21 = scalar_lea.vmem %s381_s1, %s22_s15  ;;  %p258_p6 = scmp.lt.s32.totalorder %s384_s18, 0 }
  0x17   : > { %s33_s22 = sadd.s32 16, %s384_s18  ;;  %v56_v0 = vld [vmem:[%s35_s21] sm:$0x1] }
  0x18   : > { %57 = vst [vmem:[%s36_s23] sm:$0x1] %v56_v0  ;;  %s386_s22 = smov (!%p258_p6, %s33_s22), %s384_s18 }
  0x19   : > { %s37_s24 = scalar_lea.sflag [#allocation2], %s386_s22 }
  0x1a   : > { %83 = vsyncadd %s37_s24, 16  ;;  %s20_s14 = sadd.s32 1, %s346_s14  }
  0x1b   : > { %p17_p7 = scmp.ge.s32.totalorder %s20_s14, 16  }
  0x1c   :  { %s348_s25 = smov (%p17_p7), 0  }
  0x1d   :  { %19 = sbr.rel (!%p17_p7) target bundleno = 16 (0x10), region = 93 }
  0x22 LB: > { %p90_p8 = scmp.lt.s32.totalorder %s350_s25, 0  ;;  %s91_s26 = ssub.s32 0, %s350_s25  ;;  %s350_s25 = sphi %s348_s25, %s89_s25  }
  0x23   : > { %s259_s27 = smin.u32 %s350_s25, %s91_s26 }
  0x24   : > { %s93_s28 = sand.u32 15, %s259_s27  }
  0x25   : > { %s94_s29 = ssub.s32 0, %s93_s28 }
  0x26   : > { %s388_s29 = smov (!%p90_p8, %s94_s29), %s93_s28 }
  0x27   : > { %p261_p9 = scmp.lt.s32.totalorder %s388_s29, 0  ;;  %s100_s30 = sadd.s32 16, %s388_s29 }
  0x29   : > { %s390_s30 = smov (!%p261_p9, %s100_s30), %s388_s29 }
  0x2a   : > { %s102_s3 = scalar_lea.sflag [#allocation2], %s390_s30 }
  0x2b   : > { %340 = dma.done.wait %s102_s3, 16 }
  0x2c   : > { %341 = vsyncadd %s102_s3, 4294967280  ;;  %s89_s25 = sadd.s32 1, %s350_s25  }
  0x2d   : > { %p86_p10 = scmp.ge.s32.totalorder %s89_s25, 16  }
  0x2e   :  { %s353_s1 = smov (%p86_p10), [#allocation5]  }
  0x2f   :  { %88 = sbr.rel (!%p86_p10) target bundleno = 34 (0x22), region = 104  ;;  %s110_s4 = sshll.u32 (%p86_p10), %s353_s1, 4  ;;  %s111_s4 = int_to_ptr.vmem [resolvable:$true] %s110_s4 }
  0x30   :  { %s310_s5 = scalar_lea.vmem (%p86_p10), %s111_s4, 256  ;;  %p315_p12 = scmp.lt.s32.totalorder (%p86_p10), %s111_s4, %s111_s4 }
  0x31   :  { %p311_p11 = scmp.ne.s32.totalorder (%p86_p10), %s111_s4, %s310_s5  ;;  %p316_p13 = scmp.lt.s32.totalorder (%p86_p10), %s310_s5, %s310_s5 }
  0x33   :  { %p317_p0 = por (%p86_p10), %p316_p13, %p315_p12 }
  0x35   :  { %p318_p1 = pnand %p317_p0, %p311_p11 }
  0x37   :  { %321 = shalt.err (!%p318_p1)
}
  0x38   :  { %s354_s6 = smov 128   ;;  %s355_s7 = smov 8  }
  0x39   :  { %116 = dma.vmem_to_hbm [thread:$0]  %s111_s4, 256, %s382_s2, [#allocation6], %s354_s6, %s354_s6, %s355_s7  }
  0x3a   :  { %342 = dma.done.wait [#allocation6], 256  }
  0x3b   :  { %343 = vsyncadd [#allocation6], 4294967040 }
  0x3c   :  { %120 = vsyncpa [#allocation6], 1 }
  0x3d   :  { %121 = vsyncmov [#allocation2] }
  0x40   :  { %s122_s10 = vpop.sfrf %121 }
  0x41   :  { %p262_p2 = scmp.ne.s32.totalorder %s122_s10, 0 }
  0x43   :  { %126 = shalt.err (%p262_p2)  }
  0x44   :  { %128 = vsyncmov [#allocation2 + $0x1] }
  0x47   :  { %s129_s11 = vpop.sfrf %128 }
  0x48   :  { %p263_p3 = scmp.ne.s32.totalorder %s129_s11, 0 }
  0x4a   :  { %133 = shalt.err (%p263_p3)  }
  0x4b   :  { %135 = vsyncmov [#allocation2 + $0x2] }
  0x4e   :  { %s136_s12 = vpop.sfrf %135 }
  0x4f   :  { %p264_p4 = scmp.ne.s32.totalorder %s136_s12, 0 }
  0x51   :  { %140 = shalt.err (%p264_p4)  }
  0x52   :  { %142 = vsyncmov [#allocation2 + $0x3] }
  0x55   :  { %s143_s13 = vpop.sfrf %142 }
  0x56   :  { %p265_p5 = scmp.ne.s32.totalorder %s143_s13, 0 }
  0x58   :  { %147 = shalt.err (%p265_p5)  }
  0x59   :  { %149 = vsyncmov [#allocation2 + $0x4] }
  0x5c   :  { %s150_s2 = vpop.sfrf %149 }
  0x5d   :  { %p266_p6 = scmp.ne.s32.totalorder %s150_s2, 0 }
  0x5f   :  { %154 = shalt.err (%p266_p6)  }
  0x60   :  { %156 = vsyncmov [#allocation2 + $0x5] }
  0x63   :  { %s157_s14 = vpop.sfrf %156 }
  0x64   :  { %p267_p7 = scmp.ne.s32.totalorder %s157_s14, 0 }
  0x66   :  { %161 = shalt.err (%p267_p7)  }
  0x67   :  { %163 = vsyncmov [#allocation2 + $0x6] }
  0x6a   :  { %s164_s15 = vpop.sfrf %163 }
  0x6b   :  { %p268_p8 = scmp.ne.s32.totalorder %s164_s15, 0 }
  0x6d   :  { %168 = shalt.err (%p268_p8)  }
  0x6e   :  { %170 = vsyncmov [#allocation2 + $0x7] }
  0x71   :  { %s171_s0 = vpop.sfrf %170 }
  0x72   :  { %p269_p9 = scmp.ne.s32.totalorder %s171_s0, 0 }
  0x74   :  { %175 = shalt.err (%p269_p9)  }
  0x75   :  { %177 = vsyncmov [#allocation2 + $0x8] }
  0x78   :  { %s178_s16 = vpop.sfrf %177 }
  0x79   :  { %p270_p10 = scmp.ne.s32.totalorder %s178_s16, 0 }
  0x7b   :  { %182 = shalt.err (%p270_p10)  }
  0x7c   :  { %184 = vsyncmov [#allocation2 + $0x9] }
  0x7f   :  { %s185_s17 = vpop.sfrf %184 }
  0x80   :  { %p271_p11 = scmp.ne.s32.totalorder %s185_s17, 0 }
  0x82   :  { %189 = shalt.err (%p271_p11)  }
  0x83   :  { %191 = vsyncmov [#allocation2 + $0xa] }
  0x86   :  { %s192_s18 = vpop.sfrf %191 }
  0x87   :  { %p272_p12 = scmp.ne.s32.totalorder %s192_s18, 0 }
  0x89   :  { %196 = shalt.err (%p272_p12)  }
  0x8a   :  { %198 = vsyncmov [#allocation2 + $0xb] }
  0x8d   :  { %s199_s19 = vpop.sfrf %198 }
  0x8e   :  { %p273_p13 = scmp.ne.s32.totalorder %s199_s19, 0 }
  0x90   :  { %203 = shalt.err (%p273_p13)  }
  0x91   :  { %205 = vsyncmov [#allocation2 + $0xc] }
  0x94   :  { %s206_s20 = vpop.sfrf %205 }
  0x95   :  { %p274_p0 = scmp.ne.s32.totalorder %s206_s20, 0 }
  0x97   :  { %210 = shalt.err (%p274_p0)  }
  0x98   :  { %212 = vsyncmov [#allocation2 + $0xd] }
  0x9b   :  { %s213_s21 = vpop.sfrf %212 }
  0x9c   :  { %p275_p1 = scmp.ne.s32.totalorder %s213_s21, 0 }
  0x9e   :  { %217 = shalt.err (%p275_p1)  }
  0x9f   :  { %219 = vsyncmov [#allocation2 + $0xe] }
  0xa2   :  { %s220_s22 = vpop.sfrf %219 }
  0xa3   :  { %p276_p2 = scmp.ne.s32.totalorder %s220_s22, 0 }
  0xa5   :  { %224 = shalt.err (%p276_p2)  }
  0xa6   :  { %226 = vsyncmov [#allocation2 + $0xf] }
  0xa9   :  { %s227_s23 = vpop.sfrf %226 }
  0xaa   :  { %p277_p3 = scmp.ne.s32.totalorder %s227_s23, 0 }
  0xac   :  { %231 = shalt.err (%p277_p3)  }

</bundles_post_ra>
